<compile_context>
chip_gen: v5e
topology: v5e:2x2
jax: 0.10.0
libtpu: 0.0.40
codegen_flags: <defaults>
</compile_context>

<pallas_src>
import jax
import jax.numpy as jnp
from jax.experimental import pallas as pl
from jax.experimental.pallas import tpu as pltpu


def _round_up(x, m):
    return ((x + m - 1) // m) * m


def _choose_bm(B, block_rows):
    """Row-block size: multiple of 32, >= 2 grid steps for moderate B."""
    if B <= 32:
        # Tiny batch: one exact block (multiple of 8 sublanes).
        return _round_up(B, 8)
    half = _round_up(pl.cdiv(B, 2), 32)     # guarantees >= 2 grid steps
    bm = min(block_rows, half)
    bm = max(32, (bm // 32) * 32)           # multiple of 32 (packed dtypes)
    return bm


def _feature_kernel(prem_ref, hypo_ref, ss_ref, out_ref):
    # Cast in-kernel (native dtype in HBM, f32 math on the VPU).
    p = prem_ref[...].astype(jnp.float32)            # (bm, S)
    h = hypo_ref[...].astype(jnp.float32)            # (bm, S)
    # torch.cat([prem, hypo, prem - hypo, prem * hypo], dim=1) -> (bm, 4S)
    feat = jnp.concatenate([p, h, p - h, p * h], axis=1)
    # Folded BatchNorm1d (eval): y = feat * scale + shift, broadcast over rows.
    scale = ss_ref[0:1, :]                            # (1, C)
    shift = ss_ref[1:2, :]                            # (1, C)
    out_ref[...] = (feat * scale + shift).astype(out_ref.dtype)
    # Dropout is identity in eval mode.


def feature_forward(prem, hypo, gamma, beta, running_mean, running_var,
                    eps=1e-5, block_rows=4096, out_dtype=None):
    """Pallas implementation of Feature.forward (eval mode)."""
    B, S = prem.shape
    C = 4 * S
    if out_dtype is None:
        out_dtype = prem.dtype

    # Fold BN running stats + affine into one per-channel scale/shift (f32),
    # fused into a single (2, C) array (one DMA / one resident block).
    g32 = gamma.astype(jnp.float32)
    inv = 1.0 / jnp.sqrt(running_var.astype(jnp.float32) + eps)
    scale = g32 * inv
    shift = beta.astype(jnp.float32) - running_mean.astype(jnp.float32) * g32 * inv
    scale_shift = jnp.stack([scale, shift], axis=0)   # (2, C) f32

    bm = _choose_bm(B, block_rows)
    grid = (pl.cdiv(B, bm),)                          # ragged last block OK

    in_bytes = jnp.dtype(prem.dtype).itemsize
    out_bytes = jnp.dtype(out_dtype).itemsize
    cost = pl.CostEstimate(
        flops=10 * B * S,                             # sub, mul, 4S*(mul+add)
        transcendentals=0,
        bytes_accessed=2 * B * S * in_bytes + B * C * out_bytes + 2 * C * 4,
    )

    out = pl.pallas_call(
        _feature_kernel,
        out_shape=jax.ShapeDtypeStruct((B, C), out_dtype),
        grid=grid,
        in_specs=[
            pl.BlockSpec((bm, S), lambda i: (i, 0)),
            pl.BlockSpec((bm, S), lambda i: (i, 0)),
            pl.BlockSpec((2, C), lambda i: (0, 0)),
        ],
        out_specs=pl.BlockSpec((bm, C), lambda i: (i, 0)),
        compiler_params=pltpu.CompilerParams(
            dimension_semantics=("parallel",)),
        cost_estimate=cost,
    )(prem, hypo, scale_shift)
    return out


def _reference(prem, hypo, gamma, beta, running_mean, running_var, eps=1e-5):
    p = prem.astype(jnp.float32)
    h = hypo.astype(jnp.float32)
    feat = jnp.concatenate([p, h, p - h, p * h], axis=1)
    return (feat - running_mean) / jnp.sqrt(running_var + eps) * gamma + beta


if __name__ == "__main__":
    # Small shapes consistent with the module: batch=8, size=32 -> concat dim 128.
    B, SIZE = 8, 32
    C = 4 * SIZE

    key = jax.random.PRNGKey(0)
    k_p, k_h, k_g, k_b, k_m, k_v = jax.random.split(key, 6)

    prem = jax.random.normal(k_p, (B, SIZE), dtype=jnp.float32)
    hypo = jax.random.normal(k_h, (B, SIZE), dtype=jnp.float32)

    # Deterministic BatchNorm1d parameters / running stats (size*4 channels).
    gamma = 1.0 + 0.1 * jax.random.normal(k_g, (C,), dtype=jnp.float32)
    beta = 0.1 * jax.random.normal(k_b, (C,), dtype=jnp.float32)
    running_mean = 0.1 * jax.random.normal(k_m, (C,), dtype=jnp.float32)
    running_var = 1.0 + 0.1 * jax.random.uniform(k_v, (C,), dtype=jnp.float32)

    out = feature_forward(prem, hypo, gamma, beta, running_mean, running_var)
    out = jax.block_until_ready(out)
    ref = _reference(prem, hypo, gamma, beta, running_mean, running_var)
    assert out.shape == (B, C)
    assert jnp.allclose(out, ref, atol=1e-5, rtol=1e-5), "mismatch vs reference (B=8)"

    # Second check: ragged batch that exercises the multi-step grid + masked tail.
    B2 = 37
    k_p2, k_h2 = jax.random.split(jax.random.PRNGKey(1), 2)
    prem2 = jax.random.normal(k_p2, (B2, SIZE), dtype=jnp.float32)
    hypo2 = jax.random.normal(k_h2, (B2, SIZE), dtype=jnp.float32)
    out2 = feature_forward(prem2, hypo2, gamma, beta, running_mean, running_var)
    out2 = jax.block_until_ready(out2)
    ref2 = _reference(prem2, hypo2, gamma, beta, running_mean, running_var)
    assert out2.shape == (B2, C)
    assert jnp.allclose(out2, ref2, atol=1e-5, rtol=1e-5), "mismatch vs reference (B=37)"

    print("KERNEL_OK")
</pallas_src>

<mosaic_0001>
module attributes {stable_mosaic.version = 11 : i64} {
  func.func @_feature_kernel(%arg0: i32, %arg1: memref<8x32xf32, #tpu.memory_space<vmem>>, %arg2: memref<8x32xf32, #tpu.memory_space<vmem>>, %arg3: memref<2x128xf32, #tpu.memory_space<vmem>>, %arg4: memref<8x128xf32, #tpu.memory_space<vmem>>) attributes {dimension_semantics = [#tpu.dimension_semantics<parallel>], iteration_bounds = array<i64: 1>, scalar_prefetch = 0 : i64, scratch_operands = 0 : i64, tpu.core_type = #tpu.core_type<tc>, window_params = [{transform_indices = @transform_0, window_bounds = array<i64: 8, 32>}, {transform_indices = @transform_1, window_bounds = array<i64: 8, 32>}, {pipeline_mode = #tpu.pipeline_mode<synchronous>, transform_indices = @transform_2, window_bounds = array<i64: 2, 128>}, {transform_indices = @transform_3, window_bounds = array<i64: 8, 128>}]} {
    %c0 = arith.constant 0 : index
    %c0_0 = arith.constant 0 : index
    %0 = vector.load %arg1[%c0, %c0_0] : memref<8x32xf32, #tpu.memory_space<vmem>>, vector<8x32xf32>
    %c0_1 = arith.constant 0 : index
    %c0_2 = arith.constant 0 : index
    %1 = vector.load %arg2[%c0_1, %c0_2] : memref<8x32xf32, #tpu.memory_space<vmem>>, vector<8x32xf32>
    %2 = arith.subf %0, %1 : vector<8x32xf32>
    %3 = arith.mulf %0, %1 : vector<8x32xf32>
    %4 = tpu.concatenate %0, %1, %2, %3 in 1 : vector<8x32xf32>, vector<8x32xf32>, vector<8x32xf32>, vector<8x32xf32> -> vector<8x128xf32>
    %c0_3 = arith.constant 0 : index
    %c0_4 = arith.constant 0 : index
    %5 = vector.load %arg3[%c0_3, %c0_4] : memref<2x128xf32, #tpu.memory_space<vmem>>, vector<1x128xf32>
    %c1 = arith.constant 1 : index
    %c0_5 = arith.constant 0 : index
    %6 = vector.load %arg3[%c1, %c0_5] : memref<2x128xf32, #tpu.memory_space<vmem>>, vector<1x128xf32>
    %7 = vector.broadcast %5 : vector<1x128xf32> to vector<8x128xf32>
    %8 = arith.mulf %4, %7 : vector<8x128xf32>
    %9 = vector.broadcast %6 : vector<1x128xf32> to vector<8x128xf32>
    %10 = arith.addf %8, %9 : vector<8x128xf32>
    %c0_6 = arith.constant 0 : index
    %c0_7 = arith.constant 0 : index
    %11 = vector.load %arg4[%c0_6, %c0_7] : memref<8x128xf32, #tpu.memory_space<vmem>>, vector<8x128xf32>
    tpu.vector_store %arg4[%c0_6, %c0_7], %10 {strides = array<i32>} : memref<8x128xf32, #tpu.memory_space<vmem>>, vector<8x128xf32>,
    return
  }
  func.func @transform_0(%arg0: i32) -> (i32, i32) {
    %c0_i32 = arith.constant 0 : i32
    %c0_i32_0 = arith.constant 0 : i32
    return %arg0, %c0_i32 : i32, i32
  }
  func.func @transform_1(%arg0: i32) -> (i32, i32) {
    %c0_i32 = arith.constant 0 : i32
    %c0_i32_0 = arith.constant 0 : i32
    return %arg0, %c0_i32 : i32, i32
  }
  func.func @transform_2(%arg0: i32) -> (i32, i32) {
    %c0_i32 = arith.constant 0 : i32
    %c0_i32_0 = arith.constant 0 : i32
    %c0_i32_1 = arith.constant 0 : i32
    return %c0_i32, %c0_i32_0 : i32, i32
  }
  func.func @transform_3(%arg0: i32) -> (i32, i32) {
    %c0_i32 = arith.constant 0 : i32
    %c0_i32_0 = arith.constant 0 : i32
    return %arg0, %c0_i32 : i32, i32
  }
}

</mosaic_0001>

<bundles_post_ra>
// kernel: tpu_custom_call.1
= control target key start
LH: loop header
LB: loop body
LE: loop exit
PB: predicated region body
PF: predicated region fallthrough
CT: control target
= control target key end

     0   :  { %8 = vsyncpa [#allocation3], 0  ;;  %s253_s0 = inlined_call_operand.hbm [shape: f32[8,32], index: 0, kind: input, shape index: {}]   ;;  %s254_s1 = inlined_call_operand.hbm [shape: f32[8,32], index: 1, kind: input, shape index: {}]   ;;  %s255_s2 = inlined_call_operand.hbm [shape: f32[2,128], index: 2, kind: input, shape index: {}]   ;;  %s256_s3 = inlined_call_operand.hbm [shape: f32[8,128], index: 3, kind: output, shape index: {}]  }
   0x1   :  { %9 = vsyncpa [#allocation6], 0  ;;  %s27_s14 = sshll.u32 %s254_s1, 4  ;;  %s28_s14 = int_to_ptr.hbm [resolvable:$true] %s27_s14 }
   0x2   :  { %10 = vsyncpa [#allocation4], 0  ;;  %s214_s15 = smov [#allocation5]   ;;  %s16_s19 = sshll.u32 %s253_s0, 4  ;;  %s17_s19 = int_to_ptr.hbm [resolvable:$true] %s16_s19 }
   0x3   :  { %s29_s16 = sshll.u32 %s214_s15, 4  ;;  %s215_s20 = smov [#allocation2]   ;;  %s30_s16 = int_to_ptr.vmem [resolvable:$true] %s29_s16 }
   0x4   :  { %32 = dma.hbm_to_vmem [thread:$0]  %s28_s14, 128, %s30_s16, [#allocation6]  }
   0x5   :  { %s18_s21 = sshll.u32 %s215_s20, 4  ;;  %s38_s24 = sshll.u32 %s255_s2, 4  ;;  %s19_s21 = int_to_ptr.vmem [resolvable:$true] %s18_s21  ;;  %s39_s24 = int_to_ptr.hbm [resolvable:$true] %s38_s24 }
   0x6   :  { %21 = dma.hbm_to_vmem [thread:$0]  %s17_s19, 128, %s19_s21, [#allocation3]  }
   0x7   :  { %s216_s1 = smov [#allocation7]  }
   0x8   :  { %s40_s25 = sshll.u32 %s216_s1, 4  ;;  %s41_s25 = int_to_ptr.vmem [resolvable:$true] %s40_s25 }
   0x9   :  { %43 = dma.hbm_to_vmem [thread:$0]  %s39_s24, 32, %s41_s25, [#allocation6]  }
   0xa   :  { %208 = dma.done.wait [#allocation3], 128  }
   0xb   :  { %209 = vsyncadd [#allocation3], 4294967168 }
   0xc   :  { %210 = dma.done.wait [#allocation6], 160  }
   0xd   :  { %211 = vsyncadd [#allocation6], 4294967136  ;;  %v57_v0 = vld [vmem:[#allocation5] sm:$0xff]  ;;  %v56_v1 = vld [vmem:[#allocation2] sm:$0xff]  ;;  %s217_s0 = smov 32   ;;  %s218_s26 = smov 96  }
   0xe   :  { %61 = vrot.lane.b32.xlu0 %v57_v0, %s217_s0  ;;  %v59_v2 = vmul.f32 %v57_v0, %v56_v1  ;;  %v58_v3 = vsub.f32 %v56_v1, %v57_v0  ;;  %s219_s2 = smov 64   ;;  %vm72_vm0 = vcmask 261120   ;;  %vm74_vm1 = vcmask 523264   ;;  %v110_v5 = vld [vmem:[#allocation7] ss:$0 sm:$0xff]  ;;  %s220_s27 = smov [#allocation8]  }
   0xf   :  { %vm76_vm2 = vcmask 785408   ;;  %v111_v10 = vld [vmem:[#allocation7 + $0x1] ss:$0 sm:$0xff]  ;;  %s90_s28 = sshll.u32 %s220_s27, 4  ;;  %s92_s4 = sshll.u32 %s256_s3, 4  ;;  %s91_s28 = int_to_ptr.vmem [resolvable:$true] %s90_s28  ;;  %s93_s4 = int_to_ptr.hbm [resolvable:$true] %s92_s4 }
  0x10   :  { %69 = vrot.lane.b32.xlu1 %v59_v2, %s218_s26 }
  0x16   :  { %65 = vrot.lane.b32.xlu0 %v58_v3, %s219_s2 }
  0x80   :  { %v62_v4 = vpop.permute.xlu0 %61 }
  0x81   :  { %v73_v7 = vsel %vm72_vm0, %v56_v1, %v62_v4 }
  0x82   :  { %v70_v6 = vpop.permute.xlu1 %69 }
  0x88   :  { %v66_v8 = vpop.permute.xlu0 %65 }
  0x89   :  { %v75_v9 = vsel %vm74_vm1, %v73_v7, %v66_v8 }
  0x8a   :  { %v77_v11 = vsel %vm76_vm2, %v75_v9, %v70_v6 }
  0x8b   :  { %v81_v12 = vmul.f32 %v110_v5, %v77_v11 }
  0x8d   :  { %v83_v13 = vadd.f32 %v111_v10, %v81_v12 }
  0x8f   :  { %84 = vst [vmem:[#allocation8] sm:$0xff] %v83_v13 }
  0x90   :  { %95 = dma.vmem_to_hbm [thread:$0]  %s91_s28, 128, %s93_s4, [#allocation4]  }
  0x91   :  { %212 = dma.done.wait [#allocation4], 128  }
  0x92   :  { %213 = vsyncadd [#allocation4], 4294967168 }
  0x93   :  { %100 = vsyncpa [#allocation3], 1 }
  0x94   :  { %101 = vsyncpa [#allocation6], 1 }
  0x95   :  { %102 = vsyncpa [#allocation4], 1 }

</bundles_post_ra>
